<compile_context>
chip_gen: v7x
topology: tpu7x:2x2x1
jax: 0.10.0
libtpu: 0.0.40
codegen_flags: <defaults>
</compile_context>

<pallas_src>
import functools

import jax
import jax.numpy as jnp
from jax.experimental import pallas as pl
from jax.experimental.pallas import tpu as pltpu


_MIN_TILE = 16  # multiple of 16 keeps bf16 sublane packing aligned (2 rows/sublane)


def _dce_partial_kernel(logits_ref, labels_ref, mask_ref, out_ref, *,
                        total_b, tile_b, use_mxu_row_sum):
    """Per-block partial sums for the DCE loss.

    Writes a (1, 8, 128) f32 tile where sublane row r (broadcast over lanes):
      r == 0: sum over valid rows of ce_std * mask      (agree samples)
      r == 1: sum over valid rows of ce_n   * (~mask)   (disagree samples)
      r == 2: number of valid negative (~mask) rows
    """
    i = pl.program_id(0)

    logits = logits_ref[...].astype(jnp.float32)         # (TB, C) f32 in vregs
    labels = labels_ref[...]                              # (TB, 1) int32
    tb, c = logits.shape

    # Row validity: the last batch tile may extend past total_b (padded reads).
    row = jax.lax.broadcasted_iota(jnp.int32, (tb, 1), 0) + i * tile_b
    valid = row < total_b                                  # (TB, 1) bool
    validf = valid.astype(jnp.float32)

    pos = mask_ref[...].astype(jnp.float32) * validf       # valid & mask
    neg = validf - pos                                      # valid & ~mask

    # logit at the label: lane-iota compare fused directly into the reduce
    # (no f32 one-hot temp, no extra multiply).
    col = jax.lax.broadcasted_iota(jnp.int32, (tb, c), 1)
    logit_y = jnp.sum(jnp.where(col == labels, logits, 0.0),
                      axis=1, keepdims=True)                # (TB, 1)

    # numerically stable logsumexp over classes
    row_max = jnp.max(logits, axis=1, keepdims=True)                        # (TB,1)
    exp_sum = jnp.sum(jnp.exp(logits - row_max), axis=1, keepdims=True)     # (TB,1)
    lse = row_max + jnp.log(exp_sum)                                        # (TB,1)

    if use_mxu_row_sum:
        # Offload the plain row sum to the idle MXU (one fewer XLU lane
        # reduction per data vreg; matters on v7x's 2 XLUs vs 3.2 TB/s HBM).
        ones = jnp.ones((c, 128), dtype=jnp.float32)
        row_sum = jnp.dot(logits, ones,
                          preferred_element_type=jnp.float32)[:, 0:1]       # (TB,1)
    else:
        row_sum = jnp.sum(logits, axis=1, keepdims=True)                    # (TB,1)

    # Per-row losses.  Padded rows are scrubbed HERE with where (not multiply):
    # garbage logits in the padded last tile can yield NaN/Inf and NaN*0 = NaN.
    ce_std = jnp.where(valid, lse - logit_y, 0.0)                            # (TB,1)
    ce_n = jnp.where(valid, lse - (row_sum - logit_y) / jnp.float32(c - 1),
                     0.0)                                                    # (TB,1)

    s_ce_std_pos = jnp.sum(ce_std * pos)    # scalar
    s_ce_n_neg = jnp.sum(ce_n * neg)        # scalar
    n_neg = jnp.sum(neg)                    # scalar (exact small integer in f32)

    # Lane-dense (1, 8, 128) output tile via row-broadcast stores.
    out_ref[...] = jnp.zeros_like(out_ref)
    lane = jnp.zeros((1, 128), jnp.float32)
    out_ref[0, 0:1, :] = lane + s_ce_std_pos
    out_ref[0, 1:2, :] = lane + s_ce_n_neg
    out_ref[0, 2:3, :] = lane + n_neg


def dce_loss_pallas(logits, labels, mask, *, alpha=None, tile_b=None,
                    f32_tile_budget_bytes=2 * 1024 * 1024):
    """logits: (B, C) float (f32/bf16); labels: (B,) int; mask: (B,) bool -> scalar f32."""
    B, C = logits.shape
    assert C >= 2, "DCELoss requires at least 2 classes (ce_n divides by C-1)"

    itemsize = jnp.dtype(logits.dtype).itemsize

    if tile_b is None:
        # ~2 MiB per (TB, C) f32 working array (in-kernel math is f32 no
        # matter the input dtype) -> native logits buffer is <= 2 MiB.
        tile_b = max(_MIN_TILE, (f32_tile_budget_bytes // 4) // C)
        # Cap so the grid has >= ~4 steps: lets v7x split the "parallel" axis
        # across both TensorCores and gives BlockSpec steps to overlap DMA
        # with compute on every generation.
        cap = max(_MIN_TILE, (pl.cdiv(B, 4) // _MIN_TILE) * _MIN_TILE)
        tile_b = min(tile_b, cap)
        tile_b = max(_MIN_TILE, (tile_b // _MIN_TILE) * _MIN_TILE)

    if tile_b >= B:
        tile_b = B                                    # single block == full dim
    else:
        tile_b = max(8, (int(tile_b) // 8) * 8)       # (8,128) tiling constraint

    g = pl.cdiv(B, tile_b)

    # MXU row-sum offload only when the class dim is lane-aligned; otherwise
    # keep the XLU reduction (tiny/odd C gains nothing from the MXU).
    use_mxu_row_sum = (C % 128 == 0)

    # VMEM accounting: double-buffered native-dtype inputs + in-kernel f32
    # working set (cast copy, exp, selects) + MXU row-sum temps + headroom.
    in_bytes = 2 * (tile_b * C * itemsize + 2 * tile_b * 4)
    work_bytes = 6 * tile_b * C * 4
    if use_mxu_row_sum:
        work_bytes += 2 * tile_b * 128 * 4 + C * 128 * 4
    out_bytes = 2 * 8 * 128 * 4
    vmem_limit = int(in_bytes + work_bytes + out_bytes + (8 << 20))
    vmem_limit = int(min(max(vmem_limit, 24 << 20), 100 << 20))

    labels2 = labels.astype(jnp.int32).reshape(B, 1)
    mask2 = mask.astype(jnp.int32).reshape(B, 1)

    kernel = functools.partial(_dce_partial_kernel, total_b=B, tile_b=tile_b,
                               use_mxu_row_sum=use_mxu_row_sum)

    flops = 10 * B * C + (2 * B * C * 128 if use_mxu_row_sum else 0)

    partials = pl.pallas_call(
        kernel,
        out_shape=jax.ShapeDtypeStruct((g, 8, 128), jnp.float32),
        grid=(g,),
        in_specs=[
            pl.BlockSpec((tile_b, C), lambda i: (i, 0)),   # logits, native dtype
            pl.BlockSpec((tile_b, 1), lambda i: (i, 0)),   # labels (int32)
            pl.BlockSpec((tile_b, 1), lambda i: (i, 0)),   # mask   (int32)
        ],
        out_specs=pl.BlockSpec((1, 8, 128), lambda i: (i, 0, 0)),
        compiler_params=pltpu.CompilerParams(
            dimension_semantics=("parallel",),             # megacore-shardable
            vmem_limit_bytes=vmem_limit,
        ),
        cost_estimate=pl.CostEstimate(
            flops=int(flops),
            transcendentals=int(B * C),
            bytes_accessed=int(B * C * itemsize + 8 * B + g * 8 * 128 * 4),
        ),
    )(logits, labels2, mask2)

    # Final tiny combine in plain JAX (outside the kernel).
    stats = jnp.sum(partials, axis=0)        # (8, 128)
    s_ce_std_pos = stats[0, 0]
    s_ce_n_neg = stats[1, 0]
    n_neg = stats[2, 0]

    if alpha is None:
        a = 1.0 / (1.0 + n_neg)
    else:
        a = jnp.float32(alpha)

    # Single formula covers all three dce_loss branches exactly:
    #   mask.all():   n_neg=0  -> sum_ce_std/B            (CE mean)
    #   (~mask).all():          -> a*sum_ce_n/B           ((ce_n*a).mean())
    #   mixed:                  -> (a*sum_ce_n_neg + sum_ce_std_pos)/B
    return (a * s_ce_n_neg + s_ce_std_pos) / jnp.float32(B)


def _dce_loss_ref(logits, labels, mask, alpha=None):
    """Pure-JAX reference mirroring the PyTorch dce_loss (long labels, no weight)."""
    logits = logits.astype(jnp.float32)
    B, C = logits.shape
    lse = jax.nn.logsumexp(logits, axis=1)
    logit_y = jnp.take_along_axis(logits, labels[:, None].astype(jnp.int32), axis=1)[:, 0]
    ce_std = lse - logit_y
    ce_n = -(jnp.sum(logits, axis=1) - logit_y) / (C - 1) + lse
    neg = (~mask).astype(jnp.float32)
    n_neg = jnp.sum(neg)
    a = (1.0 / (1.0 + n_neg)) if alpha is None else jnp.float32(alpha)
    loss_all_pos = jnp.mean(ce_std)
    loss_all_neg = a * jnp.mean(ce_n)
    loss_mixed = (a * jnp.sum(ce_n * neg) + jnp.sum(ce_std * (1.0 - neg))) / B
    return jnp.where(n_neg == 0, loss_all_pos,
                     jnp.where(n_neg == B, loss_all_neg, loss_mixed))


class DCELoss:
    """Pallas-backed DCELoss (defaults: weight=None, use_random_vectors=False, alpha=None)."""

    def __init__(self, weight=None, use_random_vectors=False, alpha=None):
        assert weight is None, "TODO(synk): per-sample weight not supported"
        assert not use_random_vectors, "TODO(synk): use_random_vectors not supported"
        self.alpha = alpha

    def __call__(self, logits, labels, mask, **kw):
        return dce_loss_pallas(logits, labels, mask, alpha=self.alpha, **kw)


if __name__ == "__main__":
    key = jax.random.PRNGKey(0)
    k_logits, k_labels, k_logits2, k_labels2, k_mask2 = jax.random.split(key, 5)

    B, C = 20, 128
    logits = jax.random.normal(k_logits, (B, C), dtype=jnp.float32)
    labels = jax.random.randint(k_labels, (B,), 0, C, dtype=jnp.int32)
    # mixed mask: first 14 samples "agree" (True), last 6 are disagreement samples
    mask = jnp.array([True] * 14 + [False] * 6)

    loss_fn = DCELoss()

    # multi-block path (grid=3, padded last tile) with a forced small tile
    loss_tiled = jax.block_until_ready(loss_fn(logits, labels, mask, tile_b=8))
    # auto tile (tile_b=16 -> grid=2, padded last tile)
    loss_auto = jax.block_until_ready(loss_fn(logits, labels, mask))
    ref = jax.block_until_ready(_dce_loss_ref(logits, labels, mask))

    # all-True / all-False mask branches
    loss_all_t = jax.block_until_ready(loss_fn(logits, labels, jnp.ones((B,), bool), tile_b=8))
    ref_all_t = _dce_loss_ref(logits, labels, jnp.ones((B,), bool))
    loss_all_f = jax.block_until_ready(loss_fn(logits, labels, jnp.zeros((B,), bool), tile_b=8))
    ref_all_f = _dce_loss_ref(logits, labels, jnp.zeros((B,), bool))

    # explicit alpha
    loss_fn_a = DCELoss(alpha=0.37)
    loss_alpha = jax.block_until_ready(loss_fn_a(logits, labels, mask, tile_b=8))
    ref_alpha = _dce_loss_ref(logits, labels, mask, alpha=0.37)

    # bf16 logits path: no wrapper cast, HBM traffic stays bf16
    logits_bf16 = logits.astype(jnp.bfloat16)
    loss_bf16 = jax.block_until_ready(loss_fn(logits_bf16, labels, mask, tile_b=8))
    ref_bf16 = _dce_loss_ref(logits_bf16, labels, mask)

    # class dim NOT a multiple of 128 (lane-padded logits block, XLU row-sum path)
    B2, C2 = 20, 20
    logits_c = jax.random.normal(k_logits2, (B2, C2), dtype=jnp.float32)
    labels_c = jax.random.randint(k_labels2, (B2,), 0, C2, dtype=jnp.int32)
    mask_c = jax.random.bernoulli(k_mask2, 0.7, (B2,))
    loss_c = jax.block_until_ready(loss_fn(logits_c, labels_c, mask_c, tile_b=8))
    ref_c = _dce_loss_ref(logits_c, labels_c, mask_c)

    # larger batch exercising the ">= 4 grid steps" auto cap (tile 16, grid 6)
    B3 = 96
    logits_b = jax.random.normal(k_logits2, (B3, C), dtype=jnp.float32)
    labels_b = jax.random.randint(k_labels2, (B3,), 0, C, dtype=jnp.int32)
    mask_b = jax.random.bernoulli(k_mask2, 0.6, (B3,))
    loss_b = jax.block_until_ready(loss_fn(logits_b, labels_b, mask_b))
    ref_b = _dce_loss_ref(logits_b, labels_b, mask_b)

    assert jnp.allclose(loss_tiled, ref, rtol=1e-5, atol=1e-5), (loss_tiled, ref)
    assert jnp.allclose(loss_auto, ref, rtol=1e-5, atol=1e-5), (loss_auto, ref)
    assert jnp.allclose(loss_all_t, ref_all_t, rtol=1e-5, atol=1e-5), (loss_all_t, ref_all_t)
    assert jnp.allclose(loss_all_f, ref_all_f, rtol=1e-5, atol=1e-5), (loss_all_f, ref_all_f)
    assert jnp.allclose(loss_alpha, ref_alpha, rtol=1e-5, atol=1e-5), (loss_alpha, ref_alpha)
    assert jnp.allclose(loss_bf16, ref_bf16, rtol=1e-4, atol=1e-4), (loss_bf16, ref_bf16)
    assert jnp.allclose(loss_c, ref_c, rtol=1e-5, atol=1e-5), (loss_c, ref_c)
    assert jnp.allclose(loss_b, ref_b, rtol=1e-5, atol=1e-5), (loss_b, ref_b)
    print("KERNEL_OK")
</pallas_src>

<mosaic_0001>
module attributes {stable_mosaic.version = 11 : i64} {
  func.func @_dce_partial_kernel(%arg0: i32, %arg1: memref<8x128xf32, #tpu.memory_space<vmem>>, %arg2: memref<8x1xi32, #tpu.memory_space<vmem>>, %arg3: memref<8x1xi32, #tpu.memory_space<vmem>>, %arg4: memref<1x8x128xf32, #tpu.memory_space<vmem>>) attributes {dimension_semantics = [#tpu.dimension_semantics<parallel>], iteration_bounds = array<i64: 3>, scalar_prefetch = 0 : i64, scratch_operands = 0 : i64, tpu.core_type = #tpu.core_type<tc>, window_params = [{transform_indices = @transform_0, window_bounds = array<i64: 8, 128>}, {transform_indices = @transform_1, window_bounds = array<i64: 8, 1>}, {transform_indices = @transform_2, window_bounds = array<i64: 8, 1>}, {transform_indices = @transform_3, window_bounds = array<i64: 1, 8, 128>}]} {
    %c0 = arith.constant 0 : index
    %c0_0 = arith.constant 0 : index
    %0 = vector.load %arg1[%c0, %c0_0] : memref<8x128xf32, #tpu.memory_space<vmem>>, vector<8x128xf32>
    %c0_1 = arith.constant 0 : index
    %c0_2 = arith.constant 0 : index
    %1 = vector.load %arg2[%c0_1, %c0_2] : memref<8x1xi32, #tpu.memory_space<vmem>>, vector<8x1xi32>
    %2 = tpu.iota {dimensions = array<i32: 0>} : vector<8x1xi32>
    %c8_i32 = arith.constant 8 : i32
    %3 = arith.muli %arg0, %c8_i32 : i32
    %4 = vector.broadcast %3 : i32 to vector<8x1xi32>
    %5 = arith.addi %2, %4 : vector<8x1xi32>
    %c20_i32 = arith.constant 20 : i32
    %6 = vector.broadcast %c20_i32 : i32 to vector<8x1xi32>
    %7 = arith.cmpi slt, %5, %6 : vector<8x1xi32>
    %8 = arith.extui %7 : vector<8x1xi1> to vector<8x1xi32>
    %9 = arith.sitofp %8 : vector<8x1xi32> to vector<8x1xf32>
    %c0_3 = arith.constant 0 : index
    %c0_4 = arith.constant 0 : index
    %10 = vector.load %arg3[%c0_3, %c0_4] : memref<8x1xi32, #tpu.memory_space<vmem>>, vector<8x1xi32>
    %11 = arith.sitofp %10 : vector<8x1xi32> to vector<8x1xf32>
    %12 = arith.mulf %11, %9 : vector<8x1xf32>
    %13 = arith.subf %9, %12 : vector<8x1xf32>
    %14 = tpu.iota {dimensions = array<i32: 1>} : vector<8x128xi32>
    %15 = vector.broadcast %1 : vector<8x1xi32> to vector<8x128xi32>
    %16 = arith.cmpi eq, %14, %15 : vector<8x128xi32>
    %cst = arith.constant 0.000000e+00 : f32
    %17 = vector.broadcast %cst : f32 to vector<8x128xf32>
    %18 = arith.select %16, %0, %17 : vector<8x128xi1>, vector<8x128xf32>
    %cst_5 = arith.constant dense<0.000000e+00> : vector<8xf32>
    %19 = vector.multi_reduction <add>, %18, %cst_5 [1] : vector<8x128xf32> to vector<8xf32>
    %20 = vector.shape_cast %19 : vector<8xf32> to vector<8x1xf32>
    %cst_6 = arith.constant dense<0xFF800000> : vector<8xf32>
    %21 = vector.multi_reduction <maximumf>, %0, %cst_6 [1] : vector<8x128xf32> to vector<8xf32>
    %22 = vector.shape_cast %21 : vector<8xf32> to vector<8x1xf32>
    %23 = vector.broadcast %22 : vector<8x1xf32> to vector<8x128xf32>
    %24 = arith.subf %0, %23 : vector<8x128xf32>
    %25 = math.exp %24 : vector<8x128xf32>
    %cst_7 = arith.constant dense<0.000000e+00> : vector<8xf32>
    %26 = vector.multi_reduction <add>, %25, %cst_7 [1] : vector<8x128xf32> to vector<8xf32>
    %27 = vector.shape_cast %26 : vector<8xf32> to vector<8x1xf32>
    %28 = math.log %27 : vector<8x1xf32>
    %29 = arith.addf %22, %28 : vector<8x1xf32>
    %cst_8 = arith.constant 1.000000e+00 : f32
    %30 = vector.broadcast %cst_8 : f32 to vector<128x128xf32>
    %cst_9 = arith.constant dense<0.000000e+00> : vector<8x128xf32>
    %31 = tpu.matmul %0, %30, %cst_9 {dimension_numbers = #tpu.dot_dimension_numbers<[1], [0], [0], [1], [0, 0, 1, 1], [], []>} : vector<8x128xf32>, vector<128x128xf32>, vector<8x128xf32> -> vector<8x128xf32>
    %32 = vector.extract_strided_slice %31 {offsets = [0, 0], sizes = [8, 1], strides = [1, 1]} : vector<8x128xf32> to vector<8x1xf32>
    %33 = arith.subf %29, %20 : vector<8x1xf32>
    %cst_10 = arith.constant 0.000000e+00 : f32
    %34 = vector.broadcast %cst_10 : f32 to vector<8x1xf32>
    %35 = arith.select %7, %33, %34 : vector<8x1xi1>, vector<8x1xf32>
    %36 = arith.subf %32, %20 : vector<8x1xf32>
    %cst_11 = arith.constant 1.270000e+02 : f32
    %37 = vector.broadcast %cst_11 : f32 to vector<8x1xf32>
    %38 = arith.divf %36, %37 : vector<8x1xf32>
    %39 = arith.subf %29, %38 : vector<8x1xf32>
    %cst_12 = arith.constant 0.000000e+00 : f32
    %40 = vector.broadcast %cst_12 : f32 to vector<8x1xf32>
    %41 = arith.select %7, %39, %40 : vector<8x1xi1>, vector<8x1xf32>
    %42 = arith.mulf %35, %12 : vector<8x1xf32>
    %43 = vector.shape_cast %42 : vector<8x1xf32> to vector<1x8x1xf32>
    %cst_13 = arith.constant dense<0.000000e+00> : vector<1xf32>
    %44 = vector.multi_reduction <add>, %43, %cst_13 [1, 2] : vector<1x8x1xf32> to vector<1xf32>
    %45 = vector.shape_cast %44 : vector<1xf32> to vector<1x1x1xf32>
    %46 = vector.extract %45[0, 0, 0] : f32 from vector<1x1x1xf32>
    %47 = arith.mulf %41, %13 : vector<8x1xf32>
    %48 = vector.shape_cast %47 : vector<8x1xf32> to vector<1x8x1xf32>
    %cst_14 = arith.constant dense<0.000000e+00> : vector<1xf32>
    %49 = vector.multi_reduction <add>, %48, %cst_14 [1, 2] : vector<1x8x1xf32> to vector<1xf32>
    %50 = vector.shape_cast %49 : vector<1xf32> to vector<1x1x1xf32>
    %51 = vector.extract %50[0, 0, 0] : f32 from vector<1x1x1xf32>
    %52 = vector.shape_cast %13 : vector<8x1xf32> to vector<1x8x1xf32>
    %cst_15 = arith.constant dense<0.000000e+00> : vector<1xf32>
    %53 = vector.multi_reduction <add>, %52, %cst_15 [1, 2] : vector<1x8x1xf32> to vector<1xf32>
    %54 = vector.shape_cast %53 : vector<1xf32> to vector<1x1x1xf32>
    %55 = vector.extract %54[0, 0, 0] : f32 from vector<1x1x1xf32>
    %cst_16 = arith.constant 0.000000e+00 : f32
    %56 = vector.broadcast %cst_16 : f32 to vector<1x8x128xf32>
    %c0_17 = arith.constant 0 : index
    %c0_18 = arith.constant 0 : index
    %c0_19 = arith.constant 0 : index
    %57 = vector.load %arg4[%c0_17, %c0_18, %c0_19] : memref<1x8x128xf32, #tpu.memory_space<vmem>>, vector<1x8x128xf32>
    tpu.vector_store %arg4[%c0_17, %c0_18, %c0_19], %56 {strides = array<i32>} : memref<1x8x128xf32, #tpu.memory_space<vmem>>, vector<1x8x128xf32>,
    %cst_20 = arith.constant 0.000000e+00 : f32
    %58 = vector.broadcast %cst_20 : f32 to vector<1x128xf32>
    %59 = vector.broadcast %46 : f32 to vector<1x128xf32>
    %60 = arith.addf %58, %59 : vector<1x128xf32>
    %c0_21 = arith.constant 0 : index
    %c0_22 = arith.constant 0 : index
    %c0_23 = arith.constant 0 : index
    %61 = vector.load %arg4[%c0_21, %c0_22, %c0_23] : memref<1x8x128xf32, #tpu.memory_space<vmem>>, vector<1x1x128xf32>
    %62 = vector.shape_cast %61 : vector<1x1x128xf32> to vector<1x128xf32>
    %63 = vector.shape_cast %60 : vector<1x128xf32> to vector<1x1x128xf32>
    tpu.vector_store %arg4[%c0_21, %c0_22, %c0_23], %63 {strides = array<i32>} : memref<1x8x128xf32, #tpu.memory_space<vmem>>, vector<1x1x128xf32>,
    %64 = vector.broadcast %51 : f32 to vector<1x128xf32>
    %65 = arith.addf %58, %64 : vector<1x128xf32>
    %c0_24 = arith.constant 0 : index
    %c1 = arith.constant 1 : index
    %c0_25 = arith.constant 0 : index
    %66 = vector.load %arg4[%c0_24, %c1, %c0_25] : memref<1x8x128xf32, #tpu.memory_space<vmem>>, vector<1x1x128xf32>
    %67 = vector.shape_cast %66 : vector<1x1x128xf32> to vector<1x128xf32>
    %68 = vector.shape_cast %65 : vector<1x128xf32> to vector<1x1x128xf32>
    tpu.vector_store %arg4[%c0_24, %c1, %c0_25], %68 {strides = array<i32>} : memref<1x8x128xf32, #tpu.memory_space<vmem>>, vector<1x1x128xf32>,
    %69 = vector.broadcast %55 : f32 to vector<1x128xf32>
    %70 = arith.addf %58, %69 : vector<1x128xf32>
    %c0_26 = arith.constant 0 : index
    %c2 = arith.constant 2 : index
    %c0_27 = arith.constant 0 : index
    %71 = vector.load %arg4[%c0_26, %c2, %c0_27] : memref<1x8x128xf32, #tpu.memory_space<vmem>>, vector<1x1x128xf32>
    %72 = vector.shape_cast %71 : vector<1x1x128xf32> to vector<1x128xf32>
    %73 = vector.shape_cast %70 : vector<1x128xf32> to vector<1x1x128xf32>
    tpu.vector_store %arg4[%c0_26, %c2, %c0_27], %73 {strides = array<i32>} : memref<1x8x128xf32, #tpu.memory_space<vmem>>, vector<1x1x128xf32>,
    return
  }
  func.func @transform_0(%arg0: i32) -> (i32, i32) {
    %c0_i32 = arith.constant 0 : i32
    %c0_i32_0 = arith.constant 0 : i32
    return %arg0, %c0_i32 : i32, i32
  }
  func.func @transform_1(%arg0: i32) -> (i32, i32) {
    %c0_i32 = arith.constant 0 : i32
    %c0_i32_0 = arith.constant 0 : i32
    return %arg0, %c0_i32 : i32, i32
  }
  func.func @transform_2(%arg0: i32) -> (i32, i32) {
    %c0_i32 = arith.constant 0 : i32
    %c0_i32_0 = arith.constant 0 : i32
    return %arg0, %c0_i32 : i32, i32
  }
  func.func @transform_3(%arg0: i32) -> (i32, i32, i32) {
    %c0_i32 = arith.constant 0 : i32
    %c0_i32_0 = arith.constant 0 : i32
    %c0_i32_1 = arith.constant 0 : i32
    return %arg0, %c0_i32, %c0_i32_0 : i32, i32, i32
  }
}

</mosaic_0001>

<bundles_post_ra>
// kernel: tpu_custom_call.1
= control target key start
LH: loop header
LB: loop body
LE: loop exit
PB: predicated region body
PF: predicated region fallthrough
CT: control target
= control target key end

     0   :  { %8 = vsyncpa [#allocation3], 0  ;;  %s803_s0 = inlined_call_operand.vmem [shape: f32[20,128], index: 0, kind: input, shape index: {}]   ;;  %s804_s1 = inlined_call_operand.vmem [shape: s32[20,1], index: 1, kind: input, shape index: {}]   ;;  %s805_s2 = inlined_call_operand.vmem [shape: s32[20,1], index: 2, kind: input, shape index: {}]   ;;  %s806_s3 = inlined_call_operand.hbm [shape: f32[3,8,128], index: 3, kind: output, shape index: {}]  }
   0x1   :  { %10 = vsyncpa [#allocation3 + $0x1], 0  ;;  %s677_s12 = smov 0   ;;  %s679_s13 = smov 0  }
   0x2   :  { %s681_s14 = smov 0   ;;  %s683_s15 = smov 0  }
   0x3 LB: > { %s698_s16 = sadd.s32 4294967295, %s649_s15   ;;  %s450_s17 = sadd.s32 4294967294, %s649_s15   ;;  %s649_s15 = sphi %s683_s15, %s812_s15   ;;  %s645_s14 = sphi %s681_s14, %s811_s14   ;;  %s641_s13 = sphi %s679_s13, %s810_s13   ;;  %s637_s12 = sphi %s677_s12, %s809_s12  }
   0x4   : > { %s702_s18 = sadd.s32 1, %s649_s15   ;;  %s101_s19 = sadd.s32 1, %s645_s14 }
   0x5   : > { %s98_s20 = ssub.s32 %s649_s15, %s702_s18  ;;  %p111_p0 = scmp.ne.s32.totalorder %s645_s14, %s641_s13 }
   0x6   : > { %p99_p1 = scmp.eq.s32.totalorder %s98_s20, 0  ;;  %p112_p2 = scmp.eq.s32.totalorder %s698_s16, 2 }
   0x7   : > { %p117_p3 = scmp.ne.s32.totalorder %s641_s13, %s637_s12  ;;  %p118_p4 = scmp.eq.s32.totalorder %s450_s17, 2 }
   0x8   : > { %s713_s21 = scalar_select %p99_p1, %s645_s14, %s101_s19  }
   0x9   : > { %p715_p5 = por %p112_p2, %p111_p0  ;;  %p719_p6 = por %p118_p4, %p117_p3 }
   0xa   : > { %p453_p7 = scmp.ge.s32.totalorder %s649_s15, 1  ;;  %p157_p8 = scmp.lt.s32.totalorder %s649_s15, 4 }
   0xc   : > { %p158_p9 = pnand %p453_p7, %p157_p8 }
   0xd   : > { %p188_p10 = scmp.lt.s32.totalorder (!%p158_p9), %s698_s16, 2  ;;  %s185_s24 = sand.u32 (!%p158_p9), 1, %s641_s13   ;;  %v202_v0 = vlaneseq (!%p158_p9)  ;;  %v651_v1 = vmov (!%p158_p9), 0   ;;  %v652_v2 = vmov (!%p158_p9), 0.0|0.0   ;;  %v653_v3 = vmov (!%p158_p9), 1.0|1.0  }
   0xe   : > { %161 = sbr.rel (%p158_p9) target bundleno = 573 (0x23d), region = 32  ;;  %582 = vset.pattern.permute.xlu0 (!%p158_p9), %v651_v1  ;;  %516 = vmatprep.subr.bf16.mxu0 (!%p158_p9), %v652_v2  ;;  %s454_s25 = sshll.u32 (!%p158_p9), %s185_s24, 3  ;;  %vm654_vm0 = vmmov (!%p158_p9), 0   ;;  %v655_v6 = vmov (!%p158_p9), 0.0   ;;  %vm311_vm3 = vcmask (!%p158_p9), 7168  }
   0xf   : > { %s458_s26 = sshll.u32 (!%p158_p9), %s698_s16, 3  ;;  %517 = vmatpush3.bf16.msra.mxu0 (!%p158_p9), %v653_v3  ;;  %v203_v4 = vshrl.u32 (!%p158_p9), %v202_v0, 7  ;;  %513 = vmatprep.mubr.msk.f32.mxu0 (!%p158_p9), %vm654_vm0, %v655_v6  ;;  %s733_s29 = scalar_lea.vmem (!%p158_p9), [#allocation2], %s454_s25  ;;  %v215_v14 = vand.u32 (!%p158_p9), 127, %v202_v0 }
  0x10   : > { %v205_v5 = vstv (!%p158_p9), %s458_s26  ;;  %518 = vmatprep.subr.bf16.mxu0 (!%p158_p9), %v652_v2  ;;  %343 = vst [vmem:[%s733_s29] sm:$0xff] (!%p158_p9), %v655_v6  ;;  %s461_s20 = sshll.u32 (!%p158_p9), %s698_s16, 7  ;;  %s367_s25 = sshll.u32 (!%p158_p9), %s733_s29, 4  ;;  %s760_s25 = int_to_ptr.vmem [resolvable:$true] %s367_s25 }
  0x11   : > { %v206_v7 = vadd.s32 (!%p158_p9), %v205_v5, %v203_v4  ;;  %s354_s4 = scalar_lea.sflag (!%p158_p9), [#allocation3], %s185_s24 }
  0x13   : > { %519 = vmatpush3.bf16.msra.mxu0 (!%p158_p9), %v653_v3  ;;  %vm207_vm1 = vcmp.lt.s32.totalorder (!%p158_p9), %v206_v7, 20 }
  0x14   : > { %520 = vmatprep.subr.bf16.mxu0 (!%p158_p9), %v652_v2  ;;  %v459_v9 = vsel (!%p158_p9), %vm207_vm1, 1.0, %v655_v6 }
  0x15   : > { %s189_s27 = scalar_select %p188_p10, %s698_s16, 2 }
  0x16   : > { %s656_s16 = smov [#allocation2]  }
  0x17   : > { %s731_s28 = sshll.u32 %s189_s27, 3  ;;  %521 = vmatpush3.bf16.msra.mxu0 %v653_v3  ;;  %s591_s6 = sshll.u32 %s656_s16, 4  ;;  %s592_s6 = int_to_ptr.vmem [resolvable:$false] %s591_s6 }
  0x18   : > { %s191_s5 = scalar_lea.vmem %s803_s0, %s731_s28  ;;  %522 = vmatprep.subr.bf16.mxu0 %v652_v2  ;;  %s195_s8 = scalar_lea.vmem %s804_s1, %s731_s28 }
  0x19   : > { %v200_v8 = vld [vmem:[%s191_s5] sm:$0xff]  ;;  %s199_s11 = scalar_lea.vmem %s805_s2, %s731_s28  ;;  %s758_s28 = scalar_lea.hbm %s806_s3, %s461_s20 }
  0x1a   : > { %223 = vmax.xlane.f32.xlu0 %v200_v8  ;;  %v201_v10 = vld [vmem:[%s195_s8] sm:$0xff]  ;;  %s587_s5 = scalar_lea.vmem %s760_s25, 128  ;;  %s593_s7 = scalar_lea.vmem %s592_s6, 256 }
  0x1b   : > { %523 = vmatpush3.bf16.msra.mxu0 %v653_v3  ;;  %v210_v21 = vld [vmem:[%s199_s11] sm:$0xff]  ;;  %p588_p11 = scmp.ne.s32.totalorder %s760_s25, %s587_s5  ;;  %p594_p0 = scmp.lt.s32.totalorder %s760_s25, %s592_s6 }
  0x1c   : > { %524 = vmatprep.subr.bf16.mxu0 %v652_v2  ;;  %v211_v23 = vcvt.s32.f32 %v210_v21  ;;  %p595_p1 = scmp.lt.s32.totalorder %s593_s7, %s587_s5 }
  0x1d   : > { %p589_p12 = pnand %p588_p11, %p715_p5 }
  0x1e   : > { %v212_v26 = vmul.f32 %v459_v9, %v211_v23  ;;  %p596_p2 = por %p595_p1, %p594_p0 }
  0x1f   : > { %525 = vmatpush3.bf16.msra.mxu0 %v653_v3  ;;  %p590_p13 = pneg %p589_p12 }
  0x20   : > { %526 = vmatprep.subr.bf16.mxu0 %v652_v2  ;;  %v213_v30 = vsub.f32 %v459_v9, %v212_v26 }
  0x21   : > { %p597_p3 = pnand %p596_p2, %p590_p13 }
  0x22   : > { %v333_v39 = vsel %vm311_vm3, %v213_v30, 0.0 }
  0x23   : > { %527 = vmatpush3.bf16.msra.mxu0 %v653_v3 }
  0x24   : > { %528 = vmatprep.subr.bf16.mxu0 %v652_v2 }
  0x27   : > { %529 = vmatpush3.bf16.msra.mxu0 %v653_v3 }
  0x28   : > { %530 = vmatprep.subr.bf16.mxu0 %v652_v2 }
  0x2b   : > { %531 = vmatpush3.bf16.msra.mxu0 %v653_v3 }
  0x2e   : > { %514 = vmatmul.mubr.f32.vlgmr.msra.gmra.mrb[0].mxu0 %v200_v8 }
  0x30   : > { %217 = vperm.xlu0 %582, %v201_v10  }
  0xa7   : > { %v224_v11 = vpop.xlane.xlu0 %223 }
  0xa8   : > { %v225_v12 = vsub.f32 %v200_v8, %v224_v11 }
  0xaa   : > { %v226_v13 = vmul.f32 1.442695, %v225_v12 }
  0xac   : > { %583 = vpow2.f32 %v226_v13 }
  0xaf   : > { %v218_v15 = vpop.permute.xlu0 %217 }
  0xb0   : > { %vm219_vm2 = vcmp.eq.s32.totalorder %v215_v14, %v218_v15 }
  0xb1   : > { %v220_v17 = vsel %vm219_vm2, %v200_v8, 0.0 }
  0xb6   : > { %v584_v16 = vpop.eup %583 }
  0xb7   : > { %228 = vadd.xlane.f32.xlu1 %v584_v16 }
  0xbb   : > { %221 = vadd.xlane.f32.xlu1 %v220_v17 }
 0x101   : > { %v299_v18 = vpop.f32.mrb[0].mxu0 }
 0x102   : > { %v515_v19 = vpop.f32.mrb[1].mxu0 }
 0x144   : > { %v229_v20 = vpop.xlane.xlu1 %228 }
 0x145   : > { %585 = vlog2.f32 %v229_v20 }
 0x148   : > { %v222_v22 = vpop.xlane.xlu1 %221 }
 0x149   : > { %v305_v24 = vsub.f32 %v299_v18, %v222_v22 }
 0x14b   : > { %v307_v28 = vmul.f32 0.007874016, %v305_v24 }
 0x14f   : > { %v586_v25 = vpop.eup %585 }
 0x150   : > { %v231_v27 = vmul.f32 0.6931472, %v586_v25 }
 0x152   : > { %v232_v29 = vadd.f32 %v231_v27, %v224_v11 }
 0x154   : > { %v303_v31 = vsub.f32 %v232_v29, %v222_v22  ;;  %v308_v32 = vsub.f32 %v232_v29, %v307_v28 }
 0x156   : > { %v304_v33 = vsel %vm207_vm1, %v303_v31, 0.0  ;;  %v309_v34 = vsel %vm207_vm1, %v308_v32, 0.0 }
 0x157   : > { %v310_v35 = vmul.f32 %v304_v33, %v212_v26  ;;  %v322_v36 = vmul.f32 %v309_v34, %v213_v30 }
 0x159   : > { %v312_v37 = vsel %vm311_vm3, %v310_v35, 0.0  ;;  %v323_v38 = vsel %vm311_vm3, %v322_v36, 0.0 }
 0x15a   : > { %313 = vadd.xlane.f32.xlu1 %v312_v37 }
 0x15e   : > { %324 = vadd.xlane.f32.xlu1 %v323_v38 }
 0x162   : > { %334 = vadd.xlane.f32.xlu1 %v333_v39 }
 0x1e7   : > { %v314_v40 = vpop.xlane.xlu1 %313 }
 0x1e8   : > { %v315_v41 = vrot.slane %v314_v40, 4 }
 0x1ea   : > { %v316_v42 = vadd.f32 %v315_v41, %v314_v40 }
 0x1eb   : > { %v325_v43 = vpop.xlane.xlu1 %324 }
 0x1ec   : > { %v317_v44 = vrot.slane %v316_v42, 2  ;;  %v326_v45 = vrot.slane %v325_v43, 4 }
 0x1ee   : > { %v327_v46 = vadd.f32 %v326_v45, %v325_v43  ;;  %v318_v47 = vadd.f32 %v317_v44, %v316_v42 }
 0x1ef   : > { %v335_v48 = vpop.xlane.xlu1 %334 }
 0x1f0   : > { %v328_v49 = vrot.slane %v327_v46, 2  ;;  %v336_v50 = vrot.slane %v335_v48, 4  ;;  %v319_v51 = vrot.slane %v318_v47, 1 }
 0x1f2   : > { %v337_v52 = vadd.f32 %v336_v50, %v335_v48  ;;  %v320_v53 = vadd.f32 %v319_v51, %v318_v47  ;;  %v329_v54 = vadd.f32 %v328_v49, %v327_v46 }
 0x1f4   : > { %v338_v55 = vrot.slane %v337_v52, 2  ;;  %532 = vpush %v320_v53  ;;  %v330_v56 = vrot.slane %v329_v54, 1 }
 0x1f6   : > { %v339_v57 = vadd.f32 %v338_v55, %v337_v52  ;;  %v331_v58 = vadd.f32 %v330_v56, %v329_v54 }
 0x1f8   : > { %534 = vpush %v331_v58  ;;  %v340_v59 = vrot.slane %v339_v57, 1 }
 0x1fa   : > { %v341_v60 = vadd.f32 %v340_v59, %v339_v57 }
 0x1fc   : > { %536 = vpush %v341_v60 }
 0x225   : > { %s533_s17 = spop %532 }
 0x226   : > { %v344_v61 = vstv %s533_s17 }
 0x227   : > { %346 = vst [vmem:[%s733_s29] sm:$0x1] %v344_v61 }
 0x229   : > { %s535_s19 = spop %534 }
 0x22a   : > { %v347_v62 = vstv %s535_s19 }
 0x22b   : > { %349 = vst [vmem:[%s733_s29 + $0x1] sm:$0x1] %v347_v62 }
 0x22d   : > { %s537_s30 = spop %536 }
 0x22e   : > { %v350_v63 = vstv %s537_s30 }
 0x22f   : > { %352 = vst [vmem:[%s733_s29 + $0x2] sm:$0x1] %v350_v63 }
 0x230   : > { %600 = shalt.err (!%p597_p3)
}
 0x231   : > { %s601_s24 = scalar_lea.hbm %s758_s28, 128  ;;  %s605_s9 = scalar_lea.hbm %s806_s3, 384 }
 0x232   : > { %p602_p4 = scmp.ne.s32.totalorder %s758_s28, %s601_s24  ;;  %p606_p9 = scmp.lt.u32.totalorder %s758_s28, %s806_s3 }
 0x233   : > { %p607_p10 = scmp.lt.u32.totalorder %s605_s9, %s601_s24  ;;  %p609_p12 = scmp.lt.u32.totalorder %s601_s24, %s758_s28 }
 0x234   : > { %p603_p7 = pnand %p602_p4, %p715_p5 }
 0x235   : > { %p608_p11 = por %p607_p10, %p606_p9 }
 0x236   : > { %p604_p8 = pneg %p603_p7 }
 0x237   : > { %p610_p13 = por %p609_p12, %p608_p11 }
 0x239   : > { %p611_p0 = pnand %p610_p13, %p604_p8 }
 0x23b   : > { %614 = shalt.err (!%p611_p0)
}
 0x23c   : > { %538 = dma.vmem_to_hbm [thread:$0]  (%p715_p5), %s760_s25, 128, %s758_s28, %s354_s4  }
 0x23d PF: > { %p544_p1 = scmp.ge.s32.totalorder %s649_s15, 2  ;;  %s379_s17 = sand.u32 1, %s637_s12  }
 0x23e   : > { %s380_s19 = scalar_lea.sflag [#allocation3], %s379_s17 }
 0x23f   : > { %p541_p2 = pnand %p544_p1, %p719_p6 }
 0x241   : > { %632 = dma.done.wait (!%p541_p2), %s380_s19, 128  }
 0x242   : > { %634 = vsyncadd (!%p541_p2), %s380_s19, 4294967168  ;;  %p13_p3 = scmp.ge.s32.totalorder %s702_s18, 5   ;;  %s809_s12 = smov %s641_s13 }
 0x243   : > { %s810_s13 = smov %s645_s14  ;;  %s811_s14 = smov %s713_s21 }
 0x244   : > { %s812_s15 = smov %s702_s18  ;;  %15 = sbr.rel (!%p13_p3) target bundleno = 3 (0x3), region = 73 }
 0x24b   :  { %385 = vsyncpa [#allocation3], 1 }
 0x24c   :  { %387 = vsyncpa [#allocation3 + $0x1], 1 }

</bundles_post_ra>
